<compile_context>
chip_gen: v6e
topology: v6e:2x2x1
jax: 0.10.0
libtpu: 0.0.40
codegen_flags: <defaults>
</compile_context>

<pallas_src>
import functools

import jax
import jax.numpy as jnp
from jax.experimental import pallas as pl
from jax.experimental.pallas import tpu as pltpu


def _round_up(x: int, m: int) -> int:
    return ((x + m - 1) // m) * m


def _cdiv(a: int, b: int) -> int:
    return (a + b - 1) // b


def cnn_kernel(x_ref, w_ref, b_ref, o_ref, *, k: int, m_pad: int, l_out: int):
    """Fused Conv1d -> global max-pool -> bias -> ReLU for one N-tile.

    x_ref: (tile_n * m_pad, e_char)  raw activations, channels-last (bf16 or f32 rows)
    w_ref: (k, e_char, f_pad)        per-tap conv weights (lane-dense filter axis)
    b_ref: (1, f_pad)                bias (f32)
    o_ref: (tile_n, f_pad)           pooled word embeddings (f32)
    """
    rows, _ = x_ref.shape
    tile_n = rows // m_pad
    f_pad = o_ref.shape[-1]

    x2 = x_ref[...]                                            # (tile_n*m_pad, e_char)

    acc = None
    for dk in range(k):                                        # static unroll, k is small
        # One MXU matmul per tap: M = tile_n*m_pad, K = e_char, N = f_pad (lane-dense).
        y = jnp.dot(x2, w_ref[dk], preferred_element_type=jnp.float32)
        y = y.reshape(tile_n, m_pad, f_pad)                    # m_pad % 8 == 0 -> layout-preserving
        y = y[:, dk:dk + l_out, :]                             # shift tap dk onto conv position t
        acc = y if acc is None else acc + y                    # conv[:,t,:] = sum_dk x[:,t+dk,:] @ w[dk]

    # Pool FIRST (only real conv positions are present -> no masking), then bias + ReLU.
    # Exact: max_t(relu(c_t + b)) == relu(max_t(c_t) + b).
    pooled = jnp.max(acc, axis=1)                              # (tile_n, f_pad)
    o_ref[...] = jnp.maximum(pooled + b_ref[...], 0.0).astype(o_ref.dtype)


@functools.partial(jax.jit, static_argnames=("max_tile_n", "compute_dtype"))
def cnn_forward(x_ncl: jax.Array, weight_fck: jax.Array, bias_f: jax.Array,
                *, max_tile_n: int = 256,
                compute_dtype=jnp.bfloat16) -> jax.Array:
    """x_ncl: (N, e_char, m_word); weight_fck: (f, e_char, k); bias_f: (f,) -> (N, f)."""
    n, e_char, m_word = x_ncl.shape
    f, _, k = weight_fck.shape
    l_out = m_word - k + 1
    assert l_out >= 1

    m_pad = _round_up(m_word, 8)            # sublane-align the conv-position axis
    f_pad = _round_up(f, 128)               # lane-dense output -> unmasked stores

    # Balanced N tiling: avoid gross padding waste and prefer >= 2 grid steps so the
    # "parallel" axis shards across both v7x TensorCores; tile stays VMEM-safe everywhere.
    grid_n = max(1, _cdiv(n, max_tile_n))
    if n >= 16:
        grid_n = max(grid_n, 2)
    grid_n = min(grid_n, _cdiv(n, 8))
    tile_n = _round_up(_cdiv(n, grid_n), 8)
    n_pad = tile_n * grid_n

    # ---- layout plumbing (cheap XLA glue: transpose/pad/cast -- NO HBM im2col) ----
    xt = jnp.transpose(x_ncl, (0, 2, 1)).astype(compute_dtype)        # (N, m_word, e_char)
    xt = jnp.pad(xt, ((0, n_pad - n), (0, m_pad - m_word), (0, 0)))   # zero rows never reach the pool
    x_rows = xt.reshape(n_pad * m_pad, e_char)                        # (N_pad*m_pad, e_char)

    # per-tap weights: (f, e_char, k) -> (k, e_char, f_pad)
    w_taps = jnp.transpose(weight_fck, (2, 1, 0)).astype(compute_dtype)
    w_taps = jnp.pad(w_taps, ((0, 0), (0, 0), (0, f_pad - f)))
    b_row = jnp.pad(bias_f.astype(jnp.float32), (0, f_pad - f)).reshape(1, f_pad)

    kern = functools.partial(cnn_kernel, k=k, m_pad=m_pad, l_out=l_out)
    out_pad = pl.pallas_call(
        kern,
        out_shape=jax.ShapeDtypeStruct((n_pad, f_pad), jnp.float32),
        grid=(grid_n,),
        in_specs=[
            pl.BlockSpec((tile_n * m_pad, e_char), lambda i: (i, 0)),  # raw activation tile (pipelined)
            pl.BlockSpec((k, e_char, f_pad), lambda i: (0, 0, 0)),     # weights stay resident
            pl.BlockSpec((1, f_pad), lambda i: (0, 0)),                # bias stays resident
        ],
        out_specs=pl.BlockSpec((tile_n, f_pad), lambda i: (i, 0)),
        compiler_params=pltpu.CompilerParams(
            dimension_semantics=("parallel",),            # megacore-shardable N axis
            vmem_limit_bytes=32 * 1024 * 1024,            # explicit; safe on v5e/v6e/v7x
        ),
    )(x_rows, w_taps, b_row)

    return out_pad[:n, :f]


def cnn_reference(x_ncl, weight_fck, bias_f):
    """Pure-JAX reference mirroring nn.Conv1d -> ReLU -> MaxPool1d -> squeeze(-1)."""
    n, c, l = x_ncl.shape
    f, _, k = weight_fck.shape
    l_out = l - k + 1
    taps = [jnp.einsum('ncw,fcw->nf', x_ncl[:, :, t:t + k], weight_fck)
            for t in range(l_out)]
    conv = jnp.stack(taps, axis=-1) + bias_f[None, :, None]   # (N, F, L_out)
    return jnp.max(jnp.maximum(conv, 0.0), axis=-1)           # (N, F)


if __name__ == "__main__":
    # Module hyper-params (small, consistent with CNN(e_char, f, m_word, k=5)).
    e_char, f, m_word, k = 32, 64, 16, 5
    batch = 8                      # = max_sentence_length * batch_size, flattened

    key = jax.random.PRNGKey(0)
    kx, kw, kb = jax.random.split(key, 3)

    # Shapes match nn.Conv1d(e_char, f, kernel_size=k): weight (f, e_char, k), bias (f,).
    bound = 1.0 / jnp.sqrt(jnp.float32(e_char * k))
    weight = jax.random.uniform(kw, (f, e_char, k), jnp.float32, -bound, bound)
    bias = jax.random.uniform(kb, (f,), jnp.float32, -bound, bound)

    x = jax.random.normal(kx, (batch, e_char, m_word), jnp.float32)
    ref = cnn_reference(x, weight, bias)

    # 1) f32 operand path: tight-tolerance validation of the kernel math.
    out_f32 = jax.block_until_ready(cnn_forward(x, weight, bias, compute_dtype=jnp.float32))
    assert out_f32.shape == (batch, f), out_f32.shape
    assert jnp.allclose(out_f32, ref, atol=1e-4, rtol=1e-4), "mismatch vs reference (f32 path)"

    # 2) Production bf16 operand path (f32 accumulation): looser tolerance.
    out_bf16 = jax.block_until_ready(cnn_forward(x, weight, bias))
    assert out_bf16.shape == (batch, f), out_bf16.shape
    assert jnp.allclose(out_bf16, ref, atol=5e-2, rtol=5e-2), "mismatch vs reference (bf16 path)"

    # 3) Exercise the multi-step grid path (grid_n >= 2, N not a tile multiple -> padded/sliced).
    batch2 = 20
    x2 = jax.random.normal(jax.random.PRNGKey(1), (batch2, e_char, m_word), jnp.float32)
    ref2 = cnn_reference(x2, weight, bias)
    out2 = jax.block_until_ready(cnn_forward(x2, weight, bias))
    assert out2.shape == (batch2, f), out2.shape
    assert jnp.allclose(out2, ref2, atol=5e-2, rtol=5e-2), "mismatch vs reference (tiled bf16)"

    print("KERNEL_OK")
</pallas_src>

<mosaic_0001>
module attributes {stable_mosaic.version = 11 : i64} {
  func.func @cnn_kernel(%arg0: i32, %arg1: memref<128x32xf32, #tpu.memory_space<vmem>>, %arg2: memref<5x32x128xf32, #tpu.memory_space<vmem>>, %arg3: memref<1x128xf32, #tpu.memory_space<vmem>>, %arg4: memref<8x128xf32, #tpu.memory_space<vmem>>) attributes {dimension_semantics = [#tpu.dimension_semantics<parallel>], iteration_bounds = array<i64: 1>, scalar_prefetch = 0 : i64, scratch_operands = 0 : i64, tpu.core_type = #tpu.core_type<tc>, window_params = [{transform_indices = @transform_0, window_bounds = array<i64: 128, 32>}, {pipeline_mode = #tpu.pipeline_mode<synchronous>, transform_indices = @transform_1, window_bounds = array<i64: 5, 32, 128>}, {pipeline_mode = #tpu.pipeline_mode<synchronous>, transform_indices = @transform_2, window_bounds = array<i64: 1, 128>}, {transform_indices = @transform_3, window_bounds = array<i64: 8, 128>}]} {
    %c0 = arith.constant 0 : index
    %c0_0 = arith.constant 0 : index
    %0 = vector.load %arg1[%c0, %c0_0] : memref<128x32xf32, #tpu.memory_space<vmem>>, vector<128x32xf32>
    %c0_1 = arith.constant 0 : index
    %c0_2 = arith.constant 0 : index
    %c0_3 = arith.constant 0 : index
    %1 = vector.load %arg2[%c0_1, %c0_2, %c0_3] : memref<5x32x128xf32, #tpu.memory_space<vmem>>, vector<1x32x128xf32>
    %2 = vector.shape_cast %1 : vector<1x32x128xf32> to vector<32x128xf32>
    %cst = arith.constant dense<0.000000e+00> : vector<128x128xf32>
    %3 = tpu.matmul %0, %2, %cst {dimension_numbers = #tpu.dot_dimension_numbers<[1], [0], [0], [1], [0, 0, 1, 1], [], []>} : vector<128x32xf32>, vector<32x128xf32>, vector<128x128xf32> -> vector<128x128xf32>
    %4 = vector.shape_cast %3 : vector<128x128xf32> to vector<8x16x128xf32>
    %5 = vector.extract_strided_slice %4 {offsets = [0, 0, 0], sizes = [8, 12, 128], strides = [1, 1, 1]} : vector<8x16x128xf32> to vector<8x12x128xf32>
    %c1 = arith.constant 1 : index
    %c0_4 = arith.constant 0 : index
    %c0_5 = arith.constant 0 : index
    %6 = vector.load %arg2[%c1, %c0_4, %c0_5] : memref<5x32x128xf32, #tpu.memory_space<vmem>>, vector<1x32x128xf32>
    %7 = vector.shape_cast %6 : vector<1x32x128xf32> to vector<32x128xf32>
    %cst_6 = arith.constant dense<0.000000e+00> : vector<128x128xf32>
    %8 = tpu.matmul %0, %7, %cst_6 {dimension_numbers = #tpu.dot_dimension_numbers<[1], [0], [0], [1], [0, 0, 1, 1], [], []>} : vector<128x32xf32>, vector<32x128xf32>, vector<128x128xf32> -> vector<128x128xf32>
    %9 = vector.shape_cast %8 : vector<128x128xf32> to vector<8x16x128xf32>
    %10 = vector.extract_strided_slice %9 {offsets = [0, 1, 0], sizes = [8, 12, 128], strides = [1, 1, 1]} : vector<8x16x128xf32> to vector<8x12x128xf32>
    %11 = arith.addf %5, %10 : vector<8x12x128xf32>
    %c2 = arith.constant 2 : index
    %c0_7 = arith.constant 0 : index
    %c0_8 = arith.constant 0 : index
    %12 = vector.load %arg2[%c2, %c0_7, %c0_8] : memref<5x32x128xf32, #tpu.memory_space<vmem>>, vector<1x32x128xf32>
    %13 = vector.shape_cast %12 : vector<1x32x128xf32> to vector<32x128xf32>
    %cst_9 = arith.constant dense<0.000000e+00> : vector<128x128xf32>
    %14 = tpu.matmul %0, %13, %cst_9 {dimension_numbers = #tpu.dot_dimension_numbers<[1], [0], [0], [1], [0, 0, 1, 1], [], []>} : vector<128x32xf32>, vector<32x128xf32>, vector<128x128xf32> -> vector<128x128xf32>
    %15 = vector.shape_cast %14 : vector<128x128xf32> to vector<8x16x128xf32>
    %16 = vector.extract_strided_slice %15 {offsets = [0, 2, 0], sizes = [8, 12, 128], strides = [1, 1, 1]} : vector<8x16x128xf32> to vector<8x12x128xf32>
    %17 = arith.addf %11, %16 : vector<8x12x128xf32>
    %c3 = arith.constant 3 : index
    %c0_10 = arith.constant 0 : index
    %c0_11 = arith.constant 0 : index
    %18 = vector.load %arg2[%c3, %c0_10, %c0_11] : memref<5x32x128xf32, #tpu.memory_space<vmem>>, vector<1x32x128xf32>
    %19 = vector.shape_cast %18 : vector<1x32x128xf32> to vector<32x128xf32>
    %cst_12 = arith.constant dense<0.000000e+00> : vector<128x128xf32>
    %20 = tpu.matmul %0, %19, %cst_12 {dimension_numbers = #tpu.dot_dimension_numbers<[1], [0], [0], [1], [0, 0, 1, 1], [], []>} : vector<128x32xf32>, vector<32x128xf32>, vector<128x128xf32> -> vector<128x128xf32>
    %21 = vector.shape_cast %20 : vector<128x128xf32> to vector<8x16x128xf32>
    %22 = vector.extract_strided_slice %21 {offsets = [0, 3, 0], sizes = [8, 12, 128], strides = [1, 1, 1]} : vector<8x16x128xf32> to vector<8x12x128xf32>
    %23 = arith.addf %17, %22 : vector<8x12x128xf32>
    %c4 = arith.constant 4 : index
    %c0_13 = arith.constant 0 : index
    %c0_14 = arith.constant 0 : index
    %24 = vector.load %arg2[%c4, %c0_13, %c0_14] : memref<5x32x128xf32, #tpu.memory_space<vmem>>, vector<1x32x128xf32>
    %25 = vector.shape_cast %24 : vector<1x32x128xf32> to vector<32x128xf32>
    %cst_15 = arith.constant dense<0.000000e+00> : vector<128x128xf32>
    %26 = tpu.matmul %0, %25, %cst_15 {dimension_numbers = #tpu.dot_dimension_numbers<[1], [0], [0], [1], [0, 0, 1, 1], [], []>} : vector<128x32xf32>, vector<32x128xf32>, vector<128x128xf32> -> vector<128x128xf32>
    %27 = vector.shape_cast %26 : vector<128x128xf32> to vector<8x16x128xf32>
    %28 = vector.extract_strided_slice %27 {offsets = [0, 4, 0], sizes = [8, 12, 128], strides = [1, 1, 1]} : vector<8x16x128xf32> to vector<8x12x128xf32>
    %29 = arith.addf %23, %28 : vector<8x12x128xf32>
    %cst_16 = arith.constant dense<0xFF800000> : vector<8x128xf32>
    %30 = vector.multi_reduction <maximumf>, %29, %cst_16 [1] : vector<8x12x128xf32> to vector<8x128xf32>
    %c0_17 = arith.constant 0 : index
    %c0_18 = arith.constant 0 : index
    %31 = vector.load %arg3[%c0_17, %c0_18] : memref<1x128xf32, #tpu.memory_space<vmem>>, vector<1x128xf32>
    %32 = vector.broadcast %31 : vector<1x128xf32> to vector<8x128xf32>
    %33 = arith.addf %30, %32 : vector<8x128xf32>
    %cst_19 = arith.constant 0.000000e+00 : f32
    %34 = vector.broadcast %cst_19 : f32 to vector<8x128xf32>
    %35 = arith.maximumf %33, %34 : vector<8x128xf32>
    %c0_20 = arith.constant 0 : index
    %c0_21 = arith.constant 0 : index
    %36 = vector.load %arg4[%c0_20, %c0_21] : memref<8x128xf32, #tpu.memory_space<vmem>>, vector<8x128xf32>
    tpu.vector_store %arg4[%c0_20, %c0_21], %35 {strides = array<i32>} : memref<8x128xf32, #tpu.memory_space<vmem>>, vector<8x128xf32>,
    return
  }
  func.func @transform_0(%arg0: i32) -> (i32, i32) {
    %c0_i32 = arith.constant 0 : i32
    %c0_i32_0 = arith.constant 0 : i32
    return %arg0, %c0_i32 : i32, i32
  }
  func.func @transform_1(%arg0: i32) -> (i32, i32, i32) {
    %c0_i32 = arith.constant 0 : i32
    %c0_i32_0 = arith.constant 0 : i32
    %c0_i32_1 = arith.constant 0 : i32
    %c0_i32_2 = arith.constant 0 : i32
    return %c0_i32, %c0_i32_0, %c0_i32_1 : i32, i32, i32
  }
  func.func @transform_2(%arg0: i32) -> (i32, i32) {
    %c0_i32 = arith.constant 0 : i32
    %c0_i32_0 = arith.constant 0 : i32
    %c0_i32_1 = arith.constant 0 : i32
    return %c0_i32, %c0_i32_0 : i32, i32
  }
  func.func @transform_3(%arg0: i32) -> (i32, i32) {
    %c0_i32 = arith.constant 0 : i32
    %c0_i32_0 = arith.constant 0 : i32
    return %arg0, %c0_i32 : i32, i32
  }
}

</mosaic_0001>

<bundles_post_ra>
// kernel: cnn_forward.1
= control target key start
LH: loop header
LB: loop body
LE: loop exit
PB: predicated region body
PF: predicated region fallthrough
CT: control target
= control target key end

     0   :  { %vm35_vm0 = vcmask 261120   ;;  %s2142_s0 = inlined_call_operand.vmem [shape: f32[128,32], index: 0, kind: input, shape index: {}]   ;;  %s2143_s1 = inlined_call_operand.vmem [shape: f32[5,32,128], index: 1, kind: input, shape index: {}]   ;;  %s2144_s2 = inlined_call_operand.vmem [shape: f32[1,128], index: 2, kind: input, shape index: {}]   ;;  %s2145_s3 = inlined_call_operand.hbm [shape: f32[8,128], index: 3, kind: output, shape index: {}]  }
   0x1   :  { %v34_v0 = vld [vmem:[%s2143_s1 + $0x18] sm:$0xff]  ;;  %v33_v1 = vld [vmem:[%s2143_s1 + $0x10] sm:$0xff]  ;;  %v32_v2 = vld [vmem:[%s2143_s1 + $0x8] sm:$0xff] }
   0x2   :  { %1610 = vmatprep.subr.mxu1 %v34_v0  ;;  %1450 = vmatprep.subr.mxu0 %v34_v0  ;;  %v31_v3 = vld [vmem:[%s2143_s1] sm:$0xff]  ;;  %v1687_v6 = vld [vmem:[%s2142_s0 + $0x48] sm:$0xff]  ;;  %v1272_v7 = vld [vmem:[%s2143_s1 + $0x38] sm:$0xff] }
   0x3   :  { %1614 = vmatpush3.msra.mxu1 %v34_v0  ;;  %1451 = vmatpush3.msra.mxu0 %v34_v0  ;;  %v1677_v4 = vld [vmem:[%s2142_s0 + $0x40] sm:$0xff]  ;;  %v1697_v8 = vld [vmem:[%s2142_s0 + $0x8] sm:$0xff]  ;;  %v1292_v9 = vld [vmem:[%s2143_s1 + $0x58] sm:$0xff] }
   0x4   :  { %1611 = vmatprep.subr.mxu1 %v33_v1  ;;  %1452 = vmatprep.subr.mxu0 %v33_v1  ;;  %v1682_v5 = vld [vmem:[%s2142_s0] sm:$0xff]  ;;  %v1707_v10 = vld [vmem:[%s2142_s0 + $0x50] sm:$0xff]  ;;  %v1721_v12 = vld [vmem:[%s2142_s0 + $0x58] sm:$0xff] }
   0x5   :  { %1615 = vmatpush3.msra.mxu1 %v33_v1  ;;  %1453 = vmatpush3.msra.mxu0 %v33_v1  ;;  %v1714_v11 = vld [vmem:[%s2142_s0 + $0x10] sm:$0xff]  ;;  %v1731_v14 = vld [vmem:[%s2142_s0 + $0x18] sm:$0xff] }
   0x6   :  { %1612 = vmatprep.subr.mxu1 %v32_v2  ;;  %1454 = vmatprep.subr.mxu0 %v32_v2  ;;  %v1271_v13 = vld [vmem:[%s2143_s1 + $0x30] sm:$0xff] }
   0x7   :  { %1616 = vmatpush3.msra.mxu1 %v32_v2  ;;  %1455 = vmatpush3.msra.mxu0 %v32_v2 }
   0x8   :  { %1613 = vmatprep.subr.mxu1 %v31_v3  ;;  %1456 = vmatprep.subr.mxu0 %v31_v3 }
   0x9   :  { %1617 = vmatpush3.msra.mxu1 %v31_v3  ;;  %1470 = vmatprep.mubr.msk.f32.mxu1 %vm35_vm0, %v1677_v4 }
   0xa   :  { %1457 = vmatpush3.msra.mxu0 %v31_v3  ;;  %1458 = vmatprep.mubr.msk.f32.mxu0 %vm35_vm0, %v1682_v5 }
   0xb   :  { %1471 = vmatmul.mubr.msk.f32.vlgmr.msra.gmra.mxu1 %vm35_vm0, %v1687_v6  ;;  %1482 = vmatprep.subr.mxu1 %v1272_v7 }
   0xc   :  { %1459 = vmatmul.mubr.msk.f32.vlgmr.msra.gmra.mxu0 %vm35_vm0, %v1697_v8  ;;  %1483 = vmatpush3.msra.mxu1 %v1272_v7 }
   0xd   :  { %1514 = vmatprep.subr.mxu0 %v1292_v9  ;;  %1473 = vmatprep.mubr.msk.f32.mxu1 %vm35_vm0, %v1707_v10 }
   0xe   :  { %8 = vsyncpa [#allocation3], 0  ;;  %1515 = vmatpush3.msra.mxu0 %v1292_v9  ;;  %1461 = vmatprep.mubr.msk.f32.mxu0 %vm35_vm0, %v1714_v11  ;;  %v1291_v15 = vld [vmem:[%s2143_s1 + $0x50] sm:$0xff]  ;;  %v1741_v16 = vld [vmem:[%s2142_s0 + $0x60] sm:$0xff]  ;;  %vm395_vm1 = vcmask 1046528   ;;  %vm618_vm2 = vcmask 1045504  }
   0xf   :  { %1474 = vmatmul.mubr.msk.f32.gmra.mxu1 %vm35_vm0, %v1721_v12  ;;  %1484 = vmatprep.subr.mxu1 %v1271_v13  ;;  %v1748_v17 = vld [vmem:[%s2142_s0 + $0x20] sm:$0xff]  ;;  %v1755_v18 = vld [vmem:[%s2142_s0 + $0x68] sm:$0xff]  ;;  %v1775_v22 = vld [vmem:[%s2142_s0 + $0x70] sm:$0xff]  ;;  %vm841_vm3 = vcmask 1044480   ;;  %vm1064_vm4 = vcmask 1043456   ;;  %vm1217_vm5 = vcmask 1041409  }
  0x10   :  { %1462 = vmatmul.mubr.msk.f32.gmra.mxu0 %vm35_vm0, %v1731_v14  ;;  %1485 = vmatpush3.msra.mxu1 %v1271_v13  ;;  %v1270_v19 = vld [vmem:[%s2143_s1 + $0x28] sm:$0xff]  ;;  %v1782_v23 = vld [vmem:[%s2142_s0 + $0x30] sm:$0xff]  ;;  %v1789_v24 = vld [vmem:[%s2142_s0 + $0x78] sm:$0xff]  ;;  %vm1220_vm6 = vcmask 1042434   ;;  %vm1223_vm7 = vcmask 1043459   ;;  %vm1226_vm8 = vcmask 1044484  }
  0x11   :  { %1516 = vmatprep.subr.mxu0 %v1291_v15  ;;  %1476 = vmatprep.mubr.msk.f32.mxu1 %vm35_vm0, %v1741_v16  ;;  %v1765_v20 = vld [vmem:[%s2142_s0 + $0x28] sm:$0xff]  ;;  %v1269_v25 = vld [vmem:[%s2143_s1 + $0x20] sm:$0xff]  ;;  %v1799_v26 = vld [vmem:[%s2142_s0 + $0x38] sm:$0xff]  ;;  %vm1229_vm9 = vcmask 1045509   ;;  %vm1232_vm10 = vcmask 1046534   ;;  %vm1235_vm11 = vcmask 1047559  }
  0x12   :  { %1517 = vmatpush3.msra.mxu0 %v1291_v15  ;;  %1464 = vmatprep.mubr.msk.f32.mxu0 %vm35_vm0, %v1748_v17  ;;  %v1290_v21 = vld [vmem:[%s2143_s1 + $0x48] sm:$0xff]  ;;  %v1289_v27 = vld [vmem:[%s2143_s1 + $0x40] sm:$0xff]  ;;  %v1312_v28 = vld [vmem:[%s2143_s1 + $0x78] sm:$0xff] }
  0x13   :  { %1477 = vmatmul.mubr.msk.f32.gmra.mxu1 %vm35_vm0, %v1755_v18  ;;  %1486 = vmatprep.subr.mxu1 %v1270_v19  ;;  %v1332_v29 = vld [vmem:[%s2143_s1 + $0x98] sm:$0xff]  ;;  %v1311_v30 = vld [vmem:[%s2143_s1 + $0x70] sm:$0xff]  ;;  %v1310_v32 = vld [vmem:[%s2143_s1 + $0x68] sm:$0xff] }
  0x14   :  { %1465 = vmatmul.mubr.msk.f32.gmra.mxu0 %vm35_vm0, %v1765_v20  ;;  %1487 = vmatpush3.msra.mxu1 %v1270_v19  ;;  %v1331_v31 = vld [vmem:[%s2143_s1 + $0x90] sm:$0xff]  ;;  %v1330_v33 = vld [vmem:[%s2143_s1 + $0x88] sm:$0xff]  ;;  %v1309_v34 = vld [vmem:[%s2143_s1 + $0x60] sm:$0xff] }
  0x15   :  { %1518 = vmatprep.subr.mxu0 %v1290_v21  ;;  %1479 = vmatprep.mubr.msk.f32.mxu1 %vm35_vm0, %v1775_v22  ;;  %v1329_v35 = vld [vmem:[%s2143_s1 + $0x80] sm:$0xff] }
  0x16   :  { %1519 = vmatpush3.msra.mxu0 %v1290_v21  ;;  %1467 = vmatprep.mubr.msk.f32.mxu0 %vm35_vm0, %v1782_v23 }
  0x17   :  { %1480 = vmatmul.mubr.msk.f32.gmra.mxu1 %vm35_vm0, %v1789_v24  ;;  %1488 = vmatprep.subr.mxu1 %v1269_v25 }
  0x18   :  { %1468 = vmatmul.mubr.msk.f32.gmra.mxu0 %vm35_vm0, %v1799_v26  ;;  %1489 = vmatpush3.msra.mxu1 %v1269_v25 }
  0x19   :  { %1520 = vmatprep.subr.mxu0 %v1289_v27  ;;  %1490 = vmatprep.mubr.msk.f32.mxu1 %vm35_vm0, %v1682_v5 }
  0x1a   :  { %1521 = vmatpush3.msra.mxu0 %v1289_v27  ;;  %1522 = vmatprep.mubr.msk.f32.mxu0 %vm35_vm0, %v1682_v5 }
  0x1b   :  { %1491 = vmatmul.mubr.msk.f32.vlgmr.msra.gmra.mxu1 %vm35_vm0, %v1697_v8  ;;  %1546 = vmatprep.subr.mxu1 %v1312_v28 }
  0x1c   :  { %1523 = vmatmul.mubr.msk.f32.vlgmr.msra.gmra.mxu0 %vm35_vm0, %v1697_v8  ;;  %1547 = vmatpush3.msra.mxu1 %v1312_v28 }
  0x1d   :  { %1578 = vmatprep.subr.mxu0 %v1332_v29  ;;  %1493 = vmatprep.mubr.msk.f32.mxu1 %vm35_vm0, %v1714_v11 }
  0x1e   :  { %1579 = vmatpush3.msra.mxu0 %v1332_v29  ;;  %1525 = vmatprep.mubr.msk.f32.mxu0 %vm35_vm0, %v1714_v11 }
  0x1f   :  { %1494 = vmatmul.mubr.msk.f32.gmra.mxu1 %vm35_vm0, %v1731_v14  ;;  %1548 = vmatprep.subr.mxu1 %v1311_v30 }
  0x20   :  { %1526 = vmatmul.mubr.msk.f32.gmra.mxu0 %vm35_vm0, %v1731_v14  ;;  %1496 = vmatprep.mubr.msk.f32.mxu1 %vm35_vm0, %v1748_v17 }
  0x21   :  { %1528 = vmatprep.mubr.msk.f32.mxu0 %vm35_vm0, %v1748_v17  ;;  %1549 = vmatpush3.msra.mxu1 %v1311_v30 }
  0x22   :  { %1580 = vmatprep.subr.mxu0 %v1331_v31  ;;  %1550 = vmatprep.subr.mxu1 %v1310_v32 }
  0x23   :  { %1497 = vmatmul.mubr.msk.f32.gmra.mxu1 %vm35_vm0, %v1765_v20  ;;  %1581 = vmatpush3.msra.mxu0 %v1331_v31 }
  0x24   :  { %1529 = vmatmul.mubr.msk.f32.gmra.mxu0 %vm35_vm0, %v1765_v20  ;;  %1499 = vmatprep.mubr.msk.f32.mxu1 %vm35_vm0, %v1782_v23 }
  0x25   :  { %1531 = vmatprep.mubr.msk.f32.mxu0 %vm35_vm0, %v1782_v23  ;;  %1551 = vmatpush3.msra.mxu1 %v1310_v32 }
  0x26   :  { %1582 = vmatprep.subr.mxu0 %v1330_v33  ;;  %1552 = vmatprep.subr.mxu1 %v1309_v34 }
  0x27   :  { %1500 = vmatmul.mubr.msk.f32.gmra.mxu1 %vm35_vm0, %v1799_v26  ;;  %1583 = vmatpush3.msra.mxu0 %v1330_v33 }
  0x28   :  { %1532 = vmatmul.mubr.msk.f32.gmra.mxu0 %vm35_vm0, %v1799_v26  ;;  %1502 = vmatprep.mubr.msk.f32.mxu1 %vm35_vm0, %v1677_v4 }
  0x29   :  { %1534 = vmatprep.mubr.msk.f32.mxu0 %vm35_vm0, %v1677_v4  ;;  %1553 = vmatpush3.msra.mxu1 %v1309_v34 }
  0x2a   :  { %1584 = vmatprep.subr.mxu0 %v1329_v35 }
  0x2b   :  { %1503 = vmatmul.mubr.msk.f32.gmra.mxu1 %vm35_vm0, %v1687_v6  ;;  %1585 = vmatpush3.msra.mxu0 %v1329_v35 }
  0x2c   :  { %1535 = vmatmul.mubr.msk.f32.gmra.mxu0 %vm35_vm0, %v1687_v6  ;;  %1505 = vmatprep.mubr.msk.f32.mxu1 %vm35_vm0, %v1707_v10 }
  0x2d   :  { %1537 = vmatprep.mubr.msk.f32.mxu0 %vm35_vm0, %v1707_v10 }
  0x2f   :  { %1506 = vmatmul.mubr.msk.f32.gmra.mxu1 %vm35_vm0, %v1721_v12 }
  0x30   :  { %1538 = vmatmul.mubr.msk.f32.gmra.mxu0 %vm35_vm0, %v1721_v12  ;;  %1508 = vmatprep.mubr.msk.f32.mxu1 %vm35_vm0, %v1741_v16 }
  0x31   :  { %1540 = vmatprep.mubr.msk.f32.mxu0 %vm35_vm0, %v1741_v16 }
  0x33   :  { %1509 = vmatmul.mubr.msk.f32.gmra.mxu1 %vm35_vm0, %v1755_v18 }
  0x34   :  { %1541 = vmatmul.mubr.msk.f32.gmra.mxu0 %vm35_vm0, %v1755_v18  ;;  %1511 = vmatprep.mubr.msk.f32.mxu1 %vm35_vm0, %v1775_v22 }
  0x35   :  { %1543 = vmatprep.mubr.msk.f32.mxu0 %vm35_vm0, %v1775_v22 }
  0x37   :  { %1512 = vmatmul.mubr.msk.f32.gmra.mxu1 %vm35_vm0, %v1789_v24 }
  0x38   :  { %1544 = vmatmul.mubr.msk.f32.gmra.mxu0 %vm35_vm0, %v1789_v24  ;;  %1554 = vmatprep.mubr.msk.f32.mxu1 %vm35_vm0, %v1682_v5 }
  0x39   :  { %1586 = vmatprep.mubr.msk.f32.mxu0 %vm35_vm0, %v1682_v5 }
  0x3b   :  { %1555 = vmatmul.mubr.msk.f32.vlgmr.msra.gmra.mxu1 %vm35_vm0, %v1697_v8 }
  0x3c   :  { %1587 = vmatmul.mubr.msk.f32.vlgmr.msra.gmra.mxu0 %vm35_vm0, %v1697_v8  ;;  %1557 = vmatprep.mubr.msk.f32.mxu1 %vm35_vm0, %v1714_v11 }
  0x3d   :  { %1589 = vmatprep.mubr.msk.f32.mxu0 %vm35_vm0, %v1714_v11 }
  0x3f   :  { %1558 = vmatmul.mubr.msk.f32.gmra.mxu1 %vm35_vm0, %v1731_v14 }
  0x40   :  { %1590 = vmatmul.mubr.msk.f32.gmra.mxu0 %vm35_vm0, %v1731_v14  ;;  %1560 = vmatprep.mubr.msk.f32.mxu1 %vm35_vm0, %v1748_v17 }
  0x41   :  { %1592 = vmatprep.mubr.msk.f32.mxu0 %vm35_vm0, %v1748_v17 }
  0x43   :  { %1561 = vmatmul.mubr.msk.f32.gmra.mxu1 %vm35_vm0, %v1765_v20 }
  0x44   :  { %1593 = vmatmul.mubr.msk.f32.gmra.mxu0 %vm35_vm0, %v1765_v20  ;;  %1563 = vmatprep.mubr.msk.f32.mxu1 %vm35_vm0, %v1782_v23 }
  0x45   :  { %1595 = vmatprep.mubr.msk.f32.mxu0 %vm35_vm0, %v1782_v23 }
  0x47   :  { %1564 = vmatmul.mubr.msk.f32.gmra.mxu1 %vm35_vm0, %v1799_v26 }
  0x48   :  { %1596 = vmatmul.mubr.msk.f32.gmra.mxu0 %vm35_vm0, %v1799_v26  ;;  %1566 = vmatprep.mubr.msk.f32.mxu1 %vm35_vm0, %v1677_v4 }
  0x49   :  { %1598 = vmatprep.mubr.msk.f32.mxu0 %vm35_vm0, %v1677_v4 }
  0x4b   :  { %1567 = vmatmul.mubr.msk.f32.gmra.mxu1 %vm35_vm0, %v1687_v6 }
  0x4c   :  { %1599 = vmatmul.mubr.msk.f32.gmra.mxu0 %vm35_vm0, %v1687_v6  ;;  %1569 = vmatprep.mubr.msk.f32.mxu1 %vm35_vm0, %v1707_v10 }
  0x4d   :  { %1601 = vmatprep.mubr.msk.f32.mxu0 %vm35_vm0, %v1707_v10 }
  0x4f   :  { %1570 = vmatmul.mubr.msk.f32.gmra.mxu1 %vm35_vm0, %v1721_v12 }
  0x50   :  { %1602 = vmatmul.mubr.msk.f32.gmra.mxu0 %vm35_vm0, %v1721_v12  ;;  %1572 = vmatprep.mubr.msk.f32.mxu1 %vm35_vm0, %v1741_v16 }
  0x51   :  { %1604 = vmatprep.mubr.msk.f32.mxu0 %vm35_vm0, %v1741_v16 }
  0x53   :  { %1573 = vmatmul.mubr.msk.f32.gmra.mxu1 %vm35_vm0, %v1755_v18 }
  0x54   :  { %1605 = vmatmul.mubr.msk.f32.gmra.mxu0 %vm35_vm0, %v1755_v18  ;;  %1575 = vmatprep.mubr.msk.f32.mxu1 %vm35_vm0, %v1775_v22 }
  0x55   :  { %1607 = vmatprep.mubr.msk.f32.mxu0 %vm35_vm0, %v1775_v22 }
  0x57   :  { %1576 = vmatmul.mubr.msk.f32.gmra.mxu1 %vm35_vm0, %v1789_v24 }
  0x58   :  { %1608 = vmatmul.mubr.msk.f32.gmra.mxu0 %vm35_vm0, %v1789_v24 }
  0xcb   :  { %v1962_v36 = vpop.f32.mrf.mxu1 }
  0xcc   :  { %v1460_v37 = vpop.f32.mrf.mxu0 }
  0xcd   :  { %v1964_v38 = vpop.f32.mrf.mxu1 }
  0xce   :  { %v150_v39 = vpop.f32.mrf.mxu0 }
  0xcf   :  { %v1966_v40 = vpop.f32.mrf.mxu1 }
  0xd0   :  { %v1463_v41 = vpop.f32.mrf.mxu0 }
  0xd1   :  { %v1968_v42 = vpop.f32.mrf.mxu1 }
  0xd2   :  { %v160_v43 = vpop.f32.mrf.mxu0 }
  0xd3   :  { %v1970_v44 = vpop.f32.mrf.mxu1 }
  0xd4   :  { %v1972_v45 = vpop.f32.mrf.mxu0 }
  0xd5   :  { %v1974_v46 = vpop.f32.mrf.mxu1 }
  0xd6   :  { %v1976_v47 = vpop.f32.mrf.mxu0 }
  0xd7   :  { %v1978_v48 = vpop.f32.mrf.mxu1 }
  0xd8   :  { %v1980_v49 = vpop.f32.mrf.mxu0 }
  0xd9   :  { %v1982_v50 = vpop.f32.mrf.mxu1 }
  0xda   :  { %v1984_v51 = vpop.f32.mrf.mxu0 }
  0xdb   :  { %v1492_v52 = vpop.f32.mrf.mxu1 }
  0xdc   :  { %v1524_v53 = vpop.f32.mrf.mxu0  ;;  %v397_v4 = vrot.slane %v1492_v52, 1 }
  0xdd   :  { %v300_v54 = vpop.f32.mrf.mxu1  ;;  %v620_v13 = vrot.slane %v1524_v53, 2 }
  0xde   :  { %v523_v55 = vpop.f32.mrf.mxu0  ;;  %v396_v2 = vrot.slane %v300_v54, 1  ;;  %v437_v12 = vadd.f32 %v1460_v37, %v397_v4 }
  0xdf   :  { %v1495_v56 = vpop.f32.mrf.mxu1  ;;  %v619_v16 = vrot.slane %v523_v55, 2 }
  0xe0   :  { %v1527_v57 = vpop.f32.mrf.mxu0  ;;  %v398_v9 = vsel %vm395_vm1, %v396_v2, %v397_v4  ;;  %v400_v10 = vrot.slane %v1495_v56, 1  ;;  %v2000_v27 = vadd.f32 %v620_v13, %v437_v12 }
  0xe1   :  { %v310_v58 = vpop.f32.mrf.mxu1  ;;  %v436_v18 = vadd.f32 %v398_v9, %v150_v39  ;;  %v623_v24 = vrot.slane %v1527_v57, 2  ;;  %v621_v32 = vsel %vm618_vm2, %v619_v16, %v620_v13 }
  0xe2   :  { %v533_v59 = vpop.f32.mrf.mxu0  ;;  %v399_v7 = vrot.slane %v310_v58, 1  ;;  %v439_v23 = vadd.f32 %v1463_v41, %v400_v10 }
  0xe3   :  { %v1498_v60 = vpop.f32.mrf.mxu1  ;;  %v622_v25 = vrot.slane %v533_v59, 2  ;;  %v2005_v39 = vadd.f32 %v621_v32, %v436_v18 }
  0xe4   :  { %v1986_v61 = vpop.f32.mrf.mxu0  ;;  %v401_v19 = vsel %vm395_vm1, %v399_v7, %v400_v10  ;;  %v403_v20 = vrot.slane %v1498_v60, 1  ;;  %v2010_v55 = vadd.f32 %v623_v24, %v439_v23 }
  0xe5   :  { %v320_v62 = vpop.f32.mrf.mxu1  ;;  %v438_v33 = vadd.f32 %v401_v19, %v160_v43  ;;  %v626_v34 = vrot.slane %v1986_v61, 2  ;;  %v624_v56 = vsel %vm618_vm2, %v622_v25, %v623_v24 }
  0xe6   :  { %v543_v63 = vpop.f32.mrf.mxu0  ;;  %v402_v14 = vrot.slane %v320_v62, 1  ;;  %v441_v57 = vadd.f32 %v1972_v45, %v403_v20 }
  0xe7   :  { %v1501_v0 = vpop.f32.mrf.mxu1  ;;  %v625_v35 = vrot.slane %v543_v63, 2 }
  0xe8   :  { %v1988_v1 = vpop.f32.mrf.mxu0  ;;  %v404_v28 = vsel %vm395_vm1, %v402_v14, %v403_v20  ;;  %v406_v29 = vrot.slane %v1501_v0, 1  ;;  %v2018_v0 = vadd.f32 %v624_v56, %v438_v33  ;;  %v2030_v9 = vadd.f32 %v626_v34, %v441_v57 }
  0xe9   :  { %v330_v3 = vpop.f32.mrf.mxu1  ;;  %v440_v43 = vadd.f32 %v404_v28, %v1976_v47  ;;  %v629_v59 = vrot.slane %v1988_v1, 2  ;;  %v627_v2 = vsel %vm618_vm2, %v625_v35, %v626_v34 }
  0xea   :  { %v1990_v5 = vpop.f32.mrf.mxu0  ;;  %v405_v21 = vrot.slane %v330_v3, 1  ;;  %v443_v3 = vadd.f32 %v1980_v49, %v406_v29 }
  0xeb   :  { %v1504_v6 = vpop.f32.mrf.mxu1  ;;  %v628_v60 = vrot.slane %v1990_v5, 2  ;;  %v2032_v10 = vadd.f32 %v627_v2, %v440_v43 }
  0xec   :  { %v1992_v8 = vpop.f32.mrf.mxu0  ;;  %v407_v41 = vsel %vm395_vm1, %v405_v21, %v406_v29  ;;  %v409_v52 = vrot.slane %v1504_v6, 1  ;;  %v2042_v16 = vadd.f32 %v629_v59, %v443_v3 }
  0xed   :  { %v340_v11 = vpop.f32.mrf.mxu1  ;;  %v442_v45 = vadd.f32 %v407_v41, %v1984_v51  ;;  %v632_v47 = vrot.slane %v1992_v8, 2  ;;  %v630_v12 = vsel %vm618_vm2, %v628_v60, %v629_v59 }
  0xee   :  { %v1995_v15 = vpop.f32.mrf.mxu0  ;;  %v408_v30 = vrot.slane %v340_v11, 1  ;;  %v445_v49 = vadd.f32 %v1962_v36, %v409_v52 }
  0xef   :  { %v1507_v17 = vpop.f32.mrf.mxu1  ;;  %v631_v1 = vrot.slane %v1995_v15, 2 }
  0xf0   :  { %v1998_v22 = vpop.f32.mrf.mxu0  ;;  %v410_v61 = vsel %vm395_vm1, %v408_v30, %v409_v52  ;;  %v412_v62 = vrot.slane %v1507_v17, 1  ;;  %v2044_v17 = vadd.f32 %v630_v12, %v442_v45  ;;  %v2051_v24 = vadd.f32 %v632_v47, %v445_v49 }
  0xf1   :  { %v350_v26 = vpop.f32.mrf.mxu1  ;;  %v444_v51 = vadd.f32 %v410_v61, %v1964_v38  ;;  %v635_v8 = vrot.slane %v1998_v22, 2  ;;  %v633_v38 = vsel %vm618_vm2, %v631_v1, %v632_v47 }
  0xf2   :  { %v573_v31 = vpop.f32.mrf.mxu0  ;;  %v411_v53 = vrot.slane %v350_v26, 1  ;;  %v447_v18 = vadd.f32 %v1966_v40, %v412_v62 }
  0xf3   :  { %v1510_v37 = vpop.f32.mrf.mxu1  ;;  %v634_v13 = vrot.slane %v573_v31, 2  ;;  %v2053_v25 = vadd.f32 %v633_v38, %v444_v51 }
  0xf4   :  { %v2008_v54 = vpop.f32.mrf.mxu0  ;;  %v413_v5 = vsel %vm395_vm1, %v411_v53, %v412_v62  ;;  %v415_v6 = vrot.slane %v1510_v37, 1 }
  0xf5   :  { %v360_v58 = vpop.f32.mrf.mxu1  ;;  %v446_v36 = vadd.f32 %v413_v5, %v1968_v42  ;;  %v638_v21 = vrot.slane %v2008_v54, 2  ;;  %v636_v40 = vsel %vm618_vm2, %v634_v13, %v635_v8 }
  0xf6   :  { %v583_v63 = vpop.f32.mrf.mxu0  ;;  %v414_v14 = vrot.slane %v360_v58, 1  ;;  %v449_v20 = vadd.f32 %v1970_v44, %v415_v6  ;;  %v2058_v44 = vadd.f32 %v635_v8, %v447_v18 }
  0xf7   :  { %v2023_v4 = vpop.f32.mrf.mxu1  ;;  %v637_v26 = vrot.slane %v583_v63, 2  ;;  %v2060_v33 = vadd.f32 %v636_v40, %v446_v36 }
  0xf8   :  { %v2028_v7 = vpop.f32.mrf.mxu0  ;;  %v416_v42 = vsel %vm395_vm1, %v414_v14, %v415_v6  ;;  %v418_v34 = vrot.slane %v2023_v4, 1  ;;  %v2063_v41 = vadd.f32 %v638_v21, %v449_v20 }
  0xf9   :  { %v2036_v11 = vpop.f32.mrf.mxu1  ;;  %v448_v57 = vadd.f32 %v416_v42, %v1974_v46  ;;  %v641_v60 = vrot.slane %v2028_v7, 2 }
  0xfa   :  { %v2040_v15 = vpop.f32.mrf.mxu0  ;;  %v451_v3 = vadd.f32 %v1978_v48, %v418_v34  ;;  %v417_v45 = vrot.slane %v2036_v11, 1 }
  0xfb   :  { %v1556_v19 = vpop.f32.mrf.mxu1  ;;  %v640_v48 = vrot.slane %v2040_v15, 2 }
  0xfc   :  { %v843_v22 = vrot.slane %v1556_v19, 3  ;;  %v1588_v23 = vpop.f32.mrf.mxu0  ;;  %v2084_v19 = vadd.f32 %v641_v60, %v451_v3  ;;  %v419_v40 = vsel %vm395_vm1, %v417_v45, %v418_v34 }
  0xfd   :  { %v1066_v28 = vrot.slane %v1588_v23, 4  ;;  %v746_v29 = vpop.f32.mrf.mxu1 }
  0xfe   :  { %v883_v30 = vadd.f32 %v843_v22, %v2000_v27  ;;  %v842_v31 = vrot.slane %v746_v29, 3  ;;  %v969_v32 = vpop.f32.mrf.mxu0  ;;  %v639_v27 = vsel %vm618_vm2, %v637_v26, %v638_v21 }
  0xff   :  { %v1065_v35 = vrot.slane %v969_v32, 4  ;;  %v1559_v37 = vpop.f32.mrf.mxu1  ;;  %v2076_v51 = vadd.f32 %v639_v27, %v448_v57 }
 0x100   :  { %v1106_v52 = vadd.f32 %v1066_v28, %v883_v30  ;;  %v844_v53 = vsel %vm841_vm3, %v842_v31, %v843_v22  ;;  %v846_v54 = vrot.slane %v1559_v37, 3  ;;  %v1591_v56 = vpop.f32.mrf.mxu0 }
 0x101   :  { %v882_v43 = vadd.f32 %v844_v53, %v2005_v39  ;;  %v1069_v58 = vrot.slane %v1591_v56, 4  ;;  %v756_v59 = vpop.f32.mrf.mxu1  ;;  %v1067_v61 = vsel %vm1064_vm4, %v1065_v35, %v1066_v28 }
 0x102   :  { %v885_v62 = vadd.f32 %v846_v54, %v2010_v55  ;;  %v845_v63 = vrot.slane %v756_v59, 3  ;;  %v979_v2 = vpop.f32.mrf.mxu0  ;;  %v1121_v1 = vsel %vm1064_vm4, %v1106_v52, -inf }
 0x103   :  { %v1105_v4 = vadd.f32 %v1067_v61, %v882_v43  ;;  %v1068_v46 = vrot.slane %v979_v2, 4  ;;  %v1562_v47 = vpop.f32.mrf.mxu1 }
 0x104   :  { %v1108_v39 = vadd.f32 %v1069_v58, %v885_v62  ;;  %v847_v5 = vsel %vm841_vm3, %v845_v63, %v846_v54  ;;  %v849_v6 = vrot.slane %v1562_v47, 3  ;;  %v1594_v49 = vpop.f32.mrf.mxu0 }
 0x105   :  { %v1122_v12 = vmax.f32 %v1105_v4, %v1121_v1  ;;  %v884_v55 = vadd.f32 %v847_v5, %v2018_v0  ;;  %v1072_v8 = vrot.slane %v1594_v49, 4  ;;  %v766_v13 = vpop.f32.mrf.mxu1  ;;  %v1070_v11 = vsel %vm1064_vm4, %v1068_v46, %v1069_v58 }
 0x106   :  { %v887_v14 = vadd.f32 %v849_v6, %v2030_v9  ;;  %v848_v18 = vrot.slane %v766_v13, 3  ;;  %v989_v36 = vpop.f32.mrf.mxu0  ;;  %v1129_v0 = vsel %vm1064_vm4, %v1108_v39, -inf }
 0x107   :  { %v1123_v38 = vrot.slane %v1122_v12, 4  ;;  %v1107_v20 = vadd.f32 %v1070_v11, %v884_v55  ;;  %v1071_v21 = vrot.slane %v989_v36, 4  ;;  %v1565_v22 = vpop.f32.mrf.mxu1 }
 0x108   :  { %v1110_v23 = vadd.f32 %v1072_v8, %v887_v14  ;;  %v850_v26 = vsel %vm841_vm3, %v848_v18, %v849_v6  ;;  %v852_v28 = vrot.slane %v1565_v22, 3  ;;  %v1597_v29 = vpop.f32.mrf.mxu0 }
 0x109   :  { %v1124_v9 = vmax.f32 %v1122_v12, %v1123_v38  ;;  %v1130_v42 = vmax.f32 %v1107_v20, %v1129_v0  ;;  %v886_v30 = vadd.f32 %v850_v26, %v2032_v10  ;;  %v776_v31 = vpop.f32.mrf.mxu1  ;;  %v1073_v32 = vsel %vm1064_vm4, %v1071_v21, %v1072_v8 }
 0x10a   :  { %v889_v35 = vadd.f32 %v852_v28, %v2042_v16  ;;  %v1075_v37 = vrot.slane %v1597_v29, 4  ;;  %v851_v52 = vrot.slane %v776_v31, 3  ;;  %v999_v53 = vpop.f32.mrf.mxu0  ;;  %v1137_v58 = vsel %vm1064_vm4, %v1110_v23, -inf }
 0x10b   :  { %v1125_v54 = vrot.slane %v1124_v9, 2  ;;  %v1131_v56 = vrot.slane %v1130_v42, 4  ;;  %v1109_v57 = vadd.f32 %v1073_v32, %v886_v30  ;;  %v1074_v27 = vrot.slane %v999_v53, 4  ;;  %v1568_v43 = vpop.f32.mrf.mxu1 }
 0x10c   :  { %v1112_v34 = vadd.f32 %v1075_v37, %v889_v35  ;;  %v853_v59 = vsel %vm841_vm3, %v851_v52, %v852_v28  ;;  %v855_v61 = vrot.slane %v1568_v43, 3  ;;  %v1600_v10 = vpop.f32.mrf.mxu0  ;;  %v2099_v21 = vadd.f32 %v419_v40, %v1982_v50 }
 0x10d   :  { %v1126_v62 = vmax.f32 %v1124_v9, %v1125_v54  ;;  %v1132_v63 = vmax.f32 %v1130_v42, %v1131_v56  ;;  %v1138_v2 = vmax.f32 %v1109_v57, %v1137_v58  ;;  %v888_v16 = vadd.f32 %v853_v59, %v2044_v17  ;;  %v786_v3 = vpop.f32.mrf.mxu1 }
 0x10e   :  { %v1145_v45 = vsel %vm1064_vm4, %v1112_v34, -inf  ;;  %v1076_v4 = vsel %vm1064_vm4, %v1074_v27, %v1075_v37  ;;  %v891_v46 = vadd.f32 %v855_v61, %v2051_v24  ;;  %v1078_v47 = vrot.slane %v1600_v10, 4  ;;  %v1009_v1 = vpop.f32.mrf.mxu0  ;;  %v2104_v24 = vld [vmem:[%s2144_s2] ss:$0 sm:$0xff]  ;;  %s1641_s2 = smov [#allocation2]  }
 0x10f   :  { %v1127_v39 = vrot.slane %v1126_v62, 1  ;;  %v1133_v5 = vrot.slane %v1132_v63, 2  ;;  %v1139_v6 = vrot.slane %v1138_v2, 4  ;;  %v1111_v49 = vadd.f32 %v1076_v4, %v888_v16  ;;  %v1571_v12 = vpop.f32.mrf.mxu1  ;;  %s1245_s30 = sshll.u32 %s1641_s2, 4  ;;  %s1246_s30 = int_to_ptr.vmem [resolvable:$true] %s1245_s30 }
 0x110   :  { %v1114_v55 = vadd.f32 %v1078_v47, %v891_v46  ;;  %v854_v8 = vrot.slane %v786_v3, 3  ;;  %v1077_v13 = vrot.slane %v1009_v1, 4  ;;  %v858_v11 = vrot.slane %v1571_v12, 3  ;;  %v1603_v14 = vpop.f32.mrf.mxu0  ;;  %s1619_s4 = scalar_lea.vmem %s1246_s30, 128  ;;  %p1624_p1 = scmp.lt.s32.totalorder %s1246_s30, %s1246_s30 }
 0x111   :  { %v1128_v17 = vmax.f32 %v1126_v62, %v1127_v39  ;;  %v1134_v18 = vmax.f32 %v1132_v63, %v1133_v5  ;;  %v1140_v36 = vmax.f32 %v1138_v2, %v1139_v6  ;;  %v1146_v38 = vmax.f32 %v1111_v49, %v1145_v45  ;;  %v796_v20 = vpop.f32.mrf.mxu1  ;;  %p1620_p0 = scmp.ne.s32.totalorder %s1246_s30, %s1619_s4  ;;  %p1625_p2 = scmp.lt.s32.totalorder %s1619_s4, %s1619_s4 }
 0x112   :  { %v1153_v22 = vsel %vm1064_vm4, %v1114_v55, -inf  ;;  %v856_v0 = vsel %vm841_vm3, %v854_v8, %v855_v61  ;;  %v893_v23 = vadd.f32 %v858_v11, %v2058_v44  ;;  %v1019_v26 = vpop.f32.mrf.mxu0  ;;  %v1079_v42 = vsel %vm1064_vm4, %v1077_v13, %v1078_v47 }
 0x113   :  { %v1135_v28 = vrot.slane %v1134_v18, 1  ;;  %v1141_v29 = vrot.slane %v1140_v36, 2  ;;  %v1147_v9 = vrot.slane %v1146_v38, 4  ;;  %v1574_v30 = vpop.f32.mrf.mxu1  ;;  %v890_v50 = vadd.f32 %v856_v0, %v2053_v25  ;;  %p1626_p3 = por %p1625_p2, %p1624_p1 }
 0x114   :  { %v1081_v40 = vrot.slane %v1603_v14, 4  ;;  %v857_v31 = vrot.slane %v796_v20, 3  ;;  %v1080_v32 = vrot.slane %v1019_v26, 4  ;;  %v1606_v35 = vpop.f32.mrf.mxu0  ;;  %v1192_v37 = vadd.f32 %v2104_v24, %v1128_v17 }
 0x115   :  { %v1136_v52 = vmax.f32 %v1134_v18, %v1135_v28  ;;  %v1142_v53 = vmax.f32 %v1140_v36, %v1141_v29  ;;  %v1148_v54 = vmax.f32 %v1146_v38, %v1147_v9  ;;  %v806_v56 = vpop.f32.mrf.mxu1  ;;  %v1113_v44 = vadd.f32 %v1079_v42, %v890_v50  ;;  %p1627_p4 = pnand %p1626_p3, %p1620_p0 }
 0x116   :  { %v1116_v57 = vadd.f32 %v1081_v40, %v893_v23  ;;  %v859_v27 = vsel %vm841_vm3, %v857_v31, %v858_v11  ;;  %v1082_v43 = vsel %vm1064_vm4, %v1080_v32, %v1081_v40  ;;  %v1029_v58 = vpop.f32.mrf.mxu0  ;;  %v861_v63 = vrot.slane %v1574_v30, 3 }
 0x117   :  { %v1193_v25 = vadd.f32 %v2104_v24, %v1136_v52  ;;  %v1143_v34 = vrot.slane %v1142_v53, 1  ;;  %v1149_v59 = vrot.slane %v1148_v54, 2  ;;  %v892_v61 = vadd.f32 %v859_v27, %v2060_v33  ;;  %v1577_v46 = vpop.f32.mrf.mxu1 }
 0x118   :  { %v1154_v10 = vmax.f32 %v1113_v44, %v1153_v22  ;;  %v1161_v62 = vsel %vm1064_vm4, %v1116_v57, -inf  ;;  %v1084_v2 = vrot.slane %v1606_v35, 4  ;;  %v1609_v47 = vpop.f32.mrf.mxu0  ;;  %v895_v39 = vadd.f32 %v861_v63, %v2063_v41 }
 0x119   :  { %v1201_v16 = vmax.f32 %v1193_v25, 0.0  ;;  %v1144_v3 = vmax.f32 %v1142_v53, %v1143_v34  ;;  %v1150_v45 = vmax.f32 %v1148_v54, %v1149_v59  ;;  %v1115_v4 = vadd.f32 %v1082_v43, %v892_v61  ;;  %v816_v38 = vpop.f32.mrf.mxu1 }
 0x11a   :  { %v1155_v1 = vrot.slane %v1154_v10, 4  ;;  %v860_v5 = vrot.slane %v806_v56, 3  ;;  %v1083_v6 = vrot.slane %v1029_v58, 4  ;;  %v642_v33 = vsel %vm618_vm2, %v640_v48, %v641_v60  ;;  %v1039_v7 = vpop.f32.mrf.mxu0 }
 0x11b   :  { %v1200_v49 = vmax.f32 %v1192_v37, 0.0  ;;  %v1151_v12 = vrot.slane %v1150_v45, 1  ;;  %v1162_v55 = vmax.f32 %v1115_v4, %v1161_v62  ;;  %v1216_v8 = vrot.slane %v1201_v16, 7 }
 0x11c   :  { %v1156_v13 = vmax.f32 %v1154_v10, %v1155_v1  ;;  %v1118_v11 = vadd.f32 %v1084_v2, %v895_v39  ;;  %v862_v14 = vsel %vm841_vm3, %v860_v5, %v861_v63  ;;  %v1194_v17 = vadd.f32 %v2104_v24, %v1144_v3 }
 0x11d   :  { %v1152_v18 = vmax.f32 %v1150_v45, %v1151_v12  ;;  %v1163_v41 = vrot.slane %v1162_v55, 4  ;;  %v894_v36 = vadd.f32 %v862_v14, %v2076_v51  ;;  %v1085_v15 = vsel %vm1064_vm4, %v1083_v6, %v1084_v2 }
 0x11e   :  { %v1157_v20 = vrot.slane %v1156_v13, 2  ;;  %v864_v60 = vrot.slane %v1577_v46, 3  ;;  %v1087_v48 = vrot.slane %v1609_v47, 4  ;;  %v1169_v23 = vsel %vm1064_vm4, %v1118_v11, -inf }
 0x11f   :  { %v1195_v22 = vadd.f32 %v2104_v24, %v1152_v18  ;;  %v1164_v0 = vmax.f32 %v1162_v55, %v1163_v41  ;;  %v1117_v26 = vadd.f32 %v1085_v15, %v894_v36  ;;  %v863_v9 = vrot.slane %v816_v38, 3 }
 0x120   :  { %v1158_v28 = vmax.f32 %v1156_v13, %v1157_v20  ;;  %v897_v29 = vadd.f32 %v864_v60, %v2084_v19  ;;  %v1086_v42 = vrot.slane %v1039_v7, 4  ;;  %v673_v51 = vadd.f32 %v642_v33, %v2099_v21 }
 0x121   :  { %v1165_v30 = vrot.slane %v1164_v0, 2  ;;  %v1170_v50 = vmax.f32 %v1117_v26, %v1169_v23  ;;  %v1218_v40 = vsel %vm1217_vm5, %v1216_v8, %v1200_v49  ;;  %v1202_v31 = vmax.f32 %v1194_v17, 0.0 }
 0x122   :  { %v1159_v32 = vrot.slane %v1158_v28, 1  ;;  %v1120_v35 = vadd.f32 %v1087_v48, %v897_v29  ;;  %v865_v37 = vsel %vm841_vm3, %v863_v9, %v864_v60  ;;  %v1203_v56 = vmax.f32 %v1195_v22, 0.0 }
 0x123   :  { %v1166_v52 = vmax.f32 %v1164_v0, %v1165_v30  ;;  %v1171_v53 = vrot.slane %v1170_v50, 4  ;;  %v896_v54 = vadd.f32 %v865_v37, %v673_v51  ;;  %v1088_v19 = vsel %vm1064_vm4, %v1086_v42, %v1087_v48 }
 0x124   :  { %v1160_v44 = vmax.f32 %v1158_v28, %v1159_v32  ;;  %v1219_v21 = vrot.slane %v1202_v31, 6  ;;  %v1177_v58 = vsel %vm1064_vm4, %v1120_v35, -inf  ;;  %v1222_v10 = vrot.slane %v1203_v56, 5 }
 0x125   :  { %v1167_v57 = vrot.slane %v1166_v52, 1  ;;  %v1172_v27 = vmax.f32 %v1170_v50, %v1171_v53  ;;  %v1119_v43 = vadd.f32 %v1088_v19, %v896_v54 }
 0x126   :  { %v1196_v25 = vadd.f32 %v2104_v24, %v1160_v44  ;;  %v1221_v3 = vsel %vm1220_vm6, %v1219_v21, %v1218_v40 }
 0x127   :  { %v1173_v34 = vrot.slane %v1172_v27, 2  ;;  %v1178_v59 = vmax.f32 %v1119_v43, %v1177_v58  ;;  %v1168_v61 = vmax.f32 %v1166_v52, %v1167_v57  ;;  %v1224_v1 = vsel %vm1223_vm7, %v1222_v10, %v1221_v3 }
 0x128   :  { %v1204_v62 = vmax.f32 %v1196_v25, 0.0 }
 0x129   :  { %v1174_v63 = vmax.f32 %v1172_v27, %v1173_v34  ;;  %v1179_v2 = vrot.slane %v1178_v59, 4  ;;  %v1197_v16 = vadd.f32 %v2104_v24, %v1168_v61 }
 0x12a   :  { %v1225_v45 = vrot.slane %v1204_v62, 4 }
 0x12b   :  { %v1180_v4 = vmax.f32 %v1178_v59, %v1179_v2  ;;  %v1175_v46 = vrot.slane %v1174_v63, 1  ;;  %v1205_v47 = vmax.f32 %v1197_v16, 0.0 }
 0x12c   :  { %v1227_v39 = vsel %vm1226_vm8, %v1225_v45, %v1224_v1 }
 0x12d   :  { %v1181_v5 = vrot.slane %v1180_v4, 2  ;;  %v1176_v6 = vmax.f32 %v1174_v63, %v1175_v46  ;;  %v1228_v33 = vrot.slane %v1205_v47, 3 }
 0x12f   :  { %v1182_v49 = vmax.f32 %v1180_v4, %v1181_v5  ;;  %v1198_v12 = vadd.f32 %v2104_v24, %v1176_v6  ;;  %v1230_v55 = vsel %vm1229_vm9, %v1228_v33, %v1227_v39 }
 0x131   :  { %v1183_v8 = vrot.slane %v1182_v49, 1  ;;  %v1206_v13 = vmax.f32 %v1198_v12, 0.0 }
 0x133   :  { %v1184_v11 = vmax.f32 %v1182_v49, %v1183_v8  ;;  %v1231_v14 = vrot.slane %v1206_v13, 2 }
 0x135   :  { %v1199_v17 = vadd.f32 %v2104_v24, %v1184_v11  ;;  %v1233_v18 = vsel %vm1232_vm10, %v1231_v14, %v1230_v55 }
 0x137   :  { %v1207_v41 = vmax.f32 %v1199_v17, 0.0 }
 0x139   :  { %v1234_v36 = vrot.slane %v1207_v41, 1 }
 0x13b   :  { %v1236_v38 = vsel %vm1235_vm11, %v1234_v36, %v1233_v18 }
 0x13c   :  { %1238 = vst [vmem:[#allocation2] sm:$0xff] %v1236_v38 }
 0x13d   :  { %1630 = shalt.err (!%p1627_p4)
}
 0x13e   :  { %1248 = dma.vmem_to_hbm [thread:$0]  %s1246_s30, 128, %s2145_s3, [#allocation3]  }
 0x13f   :  { %1639 = dma.done.wait [#allocation3], 128  }
 0x140   :  { %1640 = vsyncadd [#allocation3], 4294967168 }
 0x141   :  { %1252 = vsyncpa [#allocation3], 1 }

</bundles_post_ra>
